<compile_context>
chip_gen: v6e
topology: v6e:2x2x1
jax: 0.10.0
libtpu: 0.0.40
codegen_flags: <defaults>
</compile_context>

<pallas_src>
import functools
import math

import jax
import jax.numpy as jnp
from jax.experimental import pallas as pl
from jax.experimental.pallas import tpu as pltpu

_BN_EPS = 1e-3   # matches nn.BatchNorm1d(..., eps=0.001)


def _vmem_limit_bytes():
    """Scoped-VMEM limit per generation: ~3/4 of physical (v5e/v6e 128 MiB, v7x 64 MiB)."""
    try:
        cap = pltpu.get_tpu_info().vmem_capacity_bytes
    except Exception:
        cap = 64 * 1024 * 1024                     # conservative default (v7x per-TC VMEM)
    return int(min(cap * 3 // 4, 96 * 1024 * 1024))


def _pick_batch_tile(N, L_out, KC, C_out, in_itemsize, budget_bytes):
    """Pick TB (batch elems / block) s.t. TB*L_out % 128 == 0 and blocks fit the VMEM budget."""
    align = 128 // math.gcd(L_out, 128)            # smallest TB giving lane-dense blocks
    target_cols = 2048                             # lane-width target (fills the 256-wide MXU)
    tb = align * max(1, target_cols // (align * L_out))
    tb = min(tb, align * (-(-N // align)))         # no bigger than needed to cover N

    def blk_bytes(t):                              # double-buffered input + f32 output blocks
        return 2 * KC * t * L_out * in_itemsize + 2 * C_out * t * L_out * 4

    while tb > align and blk_bytes(tb) > budget_bytes:
        tb -= align
    return tb


def _stats_kernel(cols_ref, w_ref, sum_ref, sq_ref):
    """Pass 1: per-channel sum / sum-of-squares of conv(x) over this core's batch range."""
    @pl.when(pl.program_id(1) == 0)
    def _init():
        sum_ref[...] = jnp.zeros_like(sum_ref)
        sq_ref[...] = jnp.zeros_like(sq_ref)

    # single fused dot: (C_out, K*C_in) x (K*C_in, TB*L_out), f32 accumulation
    y = jnp.dot(w_ref[...], cols_ref[...], preferred_element_type=jnp.float32)
    sum_ref[...] += jnp.sum(y, axis=1, keepdims=True)
    sq_ref[...] += jnp.sum(y * y, axis=1, keepdims=True)


def _apply_kernel(cols_ref, w_ref, ss_ref, o_ref):
    """Pass 2: conv + BN affine + ReLU, written as a lane-dense (C_out, TB*L_out) block."""
    y = jnp.dot(w_ref[...], cols_ref[...], preferred_element_type=jnp.float32)
    ss = ss_ref[...]
    o_ref[...] = jnp.maximum(y * ss[:, 0:1] + ss[:, 1:2], 0.0).astype(o_ref.dtype)


def basic_conv1d_bn_relu(x, weight, gamma, beta, *, stride, padding,
                         compute_dtype=jnp.bfloat16):
    """x: (N, C_in, L) f32; weight: (C_out, C_in, K); gamma/beta: (C_out,) -> (N, C_out, L_out)."""
    N, C_in, L = x.shape
    C_out, _, K = weight.shape
    S = int(stride)
    L_pad = L + 2 * padding
    L_out = (L_pad - K) // S + 1
    assert L_out >= 1
    KC = K * C_in

    vmem_limit = _vmem_limit_bytes()
    in_itemsize = jnp.dtype(compute_dtype).itemsize
    tb = _pick_batch_tile(N, L_out, KC, C_out, in_itemsize, vmem_limit // 2)

    nb = -(-N // tb)                        # number of batch blocks
    nsplit = 2 if nb >= 2 else 1            # shard pass-1 stats across both TCs (v7x megacore)
    nb = -(-nb // nsplit) * nsplit
    steps = nb // nsplit
    N_pad = nb * tb                         # zero-padded batch: conv(0)=0 -> stats unaffected
    tbl = tb * L_out                        # lane width per block (always a multiple of 128)

    # ---- glue (built once by XLA): pad + tap-stacked im2col with batch folded onto lanes.
    # cols[k*C_in + ci, n*L_out + l] = x_pad[n, ci, l*S + k]
    x_p = jnp.pad(x, ((0, N_pad - N), (0, 0), (padding, padding)))
    taps = jnp.stack([x_p[:, :, k:k + S * (L_out - 1) + 1:S] for k in range(K)], axis=0)
    cols = taps.transpose(0, 2, 1, 3).reshape(KC, N_pad * L_out).astype(compute_dtype)
    w2 = jnp.transpose(weight, (0, 2, 1)).reshape(C_out, KC).astype(compute_dtype)

    # ---- pass 1: global BN batch statistics (per-core partial sums) ---------------------
    part_sum, part_sq = pl.pallas_call(
        _stats_kernel,
        grid=(nsplit, steps),
        in_specs=[pl.BlockSpec((KC, tbl), lambda s, i: (0, s * steps + i)),
                  pl.BlockSpec((C_out, KC), lambda s, i: (0, 0))],
        out_specs=(pl.BlockSpec((None, C_out, 1), lambda s, i: (s, 0, 0)),
                   pl.BlockSpec((None, C_out, 1), lambda s, i: (s, 0, 0))),
        out_shape=(jax.ShapeDtypeStruct((nsplit, C_out, 1), jnp.float32),
                   jax.ShapeDtypeStruct((nsplit, C_out, 1), jnp.float32)),
        compiler_params=pltpu.CompilerParams(
            dimension_semantics=("parallel", "arbitrary"),
            vmem_limit_bytes=vmem_limit),
    )(cols, w2)

    # tiny finalize on (C_out,)-sized data: combine partials -> BN (scale, shift)
    m = float(N * L_out)                              # true count (excludes batch padding)
    s1 = jnp.sum(part_sum[..., 0], axis=0)
    s2 = jnp.sum(part_sq[..., 0], axis=0)
    mean = s1 / m
    var = jnp.maximum(s2 / m - mean * mean, 0.0)      # clamp guards one-pass cancellation
    scale = gamma.astype(jnp.float32) * jax.lax.rsqrt(var + _BN_EPS)
    shift = beta.astype(jnp.float32) - mean * scale
    ss = jnp.stack([scale, shift], axis=1)            # (C_out, 2) f32

    # ---- pass 2: conv + BN affine + ReLU, lane-dense output, parallel over batch blocks --
    out_flat = pl.pallas_call(
        _apply_kernel,
        grid=(nb,),
        in_specs=[pl.BlockSpec((KC, tbl), lambda i: (0, i)),
                  pl.BlockSpec((C_out, KC), lambda i: (0, 0)),
                  pl.BlockSpec((C_out, 2), lambda i: (0, 0))],
        out_specs=pl.BlockSpec((C_out, tbl), lambda i: (0, i)),
        out_shape=jax.ShapeDtypeStruct((C_out, N_pad * L_out), jnp.float32),
        compiler_params=pltpu.CompilerParams(
            dimension_semantics=("parallel",),
            vmem_limit_bytes=vmem_limit),
    )(cols, w2, ss)

    # reshape back (reviewer-blessed): (C_out, N_pad*L_out) -> (N, C_out, L_out)
    return out_flat.reshape(C_out, N_pad, L_out)[:, :N].transpose(1, 0, 2)


def _reference(x, weight, gamma, beta, *, stride, padding):
    """Pure-JAX reference: conv1d + training-mode BN (eps=1e-3) + ReLU."""
    y = jax.lax.conv_general_dilated(
        x, weight,
        window_strides=(stride,),
        padding=[(padding, padding)],
        dimension_numbers=("NCH", "OIH", "NCH"),
    )
    mean = jnp.mean(y, axis=(0, 2), keepdims=True)
    var = jnp.mean((y - mean) ** 2, axis=(0, 2), keepdims=True)
    y_hat = (y - mean) / jnp.sqrt(var + _BN_EPS)
    return jnp.maximum(y_hat * gamma[None, :, None] + beta[None, :, None], 0.0)


if __name__ == "__main__":
    def make_inputs(case_id, N, C_in, C_out, K, L):
        key = jax.random.fold_in(jax.random.PRNGKey(0), case_id)
        kx, kw, kg, kb = jax.random.split(key, 4)
        x = jax.random.normal(kx, (N, C_in, L), dtype=jnp.float32)
        bound = 1.0 / (C_in * K) ** 0.5
        weight = jax.random.uniform(kw, (C_out, C_in, K), minval=-bound, maxval=bound,
                                    dtype=jnp.float32)
        gamma = jax.random.uniform(kg, (C_out,), minval=0.5, maxval=1.5, dtype=jnp.float32)
        beta = 0.1 * jax.random.normal(kb, (C_out,), dtype=jnp.float32)
        return x, weight, gamma, beta

    cases = [
        # name          N   Cin Cout K  s  p  L    compute dtype   atol  rtol
        ("f32_s1",      4,  4,  8,   3, 1, 1, 128, jnp.float32,    1e-4, 1e-4),
        ("bf16_s1",     4,  4,  8,   3, 1, 1, 128, jnp.bfloat16,   6e-2, 6e-2),
        ("f32_s2",      2,  4,  8,   3, 2, 1, 16,  jnp.float32,    1e-4, 1e-4),
        ("f32_s2_n3",   3,  4,  8,   3, 2, 1, 16,  jnp.float32,    1e-4, 1e-4),
        ("bf16_s1_big", 32, 4,  8,   3, 1, 1, 128, jnp.bfloat16,   6e-2, 6e-2),
    ]
    for cid, (name, N, C_in, C_out, K, stride, padding, L, cdt, atol, rtol) in enumerate(cases):
        x, weight, gamma, beta = make_inputs(cid, N, C_in, C_out, K, L)
        out = basic_conv1d_bn_relu(x, weight, gamma, beta,
                                   stride=stride, padding=padding, compute_dtype=cdt)
        out = jax.block_until_ready(out)

        L_out = (L + 2 * padding - K) // stride + 1
        assert out.shape == (N, C_out, L_out), (name, out.shape)
        ref = _reference(x, weight, gamma, beta, stride=stride, padding=padding)
        assert bool(jnp.all(jnp.isfinite(out))), f"{name}: non-finite output"
        assert jnp.allclose(out, ref, atol=atol, rtol=rtol), f"{name}: mismatch vs reference"

    print("KERNEL_OK")
</pallas_src>

<mosaic_0001>
module attributes {stable_mosaic.version = 11 : i64} {
  func.func @_stats_kernel(%arg0: i32, %arg1: i32, %arg2: memref<12x512xf32, #tpu.memory_space<vmem>>, %arg3: memref<8x12xf32, #tpu.memory_space<vmem>>, %arg4: memref<1x8x1xf32, #tpu.memory_space<vmem>>, %arg5: memref<1x8x1xf32, #tpu.memory_space<vmem>>) attributes {dimension_semantics = [#tpu.dimension_semantics<parallel>, #tpu.dimension_semantics<arbitrary>], iteration_bounds = array<i64: 1, 1>, scalar_prefetch = 0 : i64, scratch_operands = 0 : i64, tpu.core_type = #tpu.core_type<tc>, window_params = [{transform_indices = @transform_0, window_bounds = array<i64: 12, 512>}, {pipeline_mode = #tpu.pipeline_mode<synchronous>, transform_indices = @transform_1, window_bounds = array<i64: 8, 12>}, {transform_indices = @transform_2, window_bounds = array<i64: 1, 8, 1>}, {transform_indices = @transform_3, window_bounds = array<i64: 1, 8, 1>}]} {
    %c0_i32 = arith.constant 0 : i32
    %0 = arith.cmpi eq, %arg1, %c0_i32 : i32
    %1 = arith.extui %0 : i1 to i32
    %c0_i32_0 = arith.constant 0 : i32
    %2 = arith.cmpi ne, %1, %c0_i32_0 : i32
    scf.if %2 {
      %cst_18 = arith.constant 0.000000e+00 : f32
      %23 = vector.broadcast %cst_18 : f32 to vector<8x1xf32>
      %c0_19 = arith.constant 0 : index
      %c0_20 = arith.constant 0 : index
      %c0_21 = arith.constant 0 : index
      %24 = vector.load %arg4[%c0_19, %c0_20, %c0_21] : memref<1x8x1xf32, #tpu.memory_space<vmem>>, vector<1x8x1xf32>
      %25 = vector.shape_cast %24 : vector<1x8x1xf32> to vector<8x1xf32>
      %26 = vector.shape_cast %23 : vector<8x1xf32> to vector<1x8x1xf32>
      tpu.vector_store %arg4[%c0_19, %c0_20, %c0_21], %26 {strides = array<i32>} : memref<1x8x1xf32, #tpu.memory_space<vmem>>, vector<1x8x1xf32>,
      %cst_22 = arith.constant 0.000000e+00 : f32
      %27 = vector.broadcast %cst_22 : f32 to vector<8x1xf32>
      %c0_23 = arith.constant 0 : index
      %c0_24 = arith.constant 0 : index
      %c0_25 = arith.constant 0 : index
      %28 = vector.load %arg5[%c0_23, %c0_24, %c0_25] : memref<1x8x1xf32, #tpu.memory_space<vmem>>, vector<1x8x1xf32>
      %29 = vector.shape_cast %28 : vector<1x8x1xf32> to vector<8x1xf32>
      %30 = vector.shape_cast %27 : vector<8x1xf32> to vector<1x8x1xf32>
      tpu.vector_store %arg5[%c0_23, %c0_24, %c0_25], %30 {strides = array<i32>} : memref<1x8x1xf32, #tpu.memory_space<vmem>>, vector<1x8x1xf32>,
    } else {
    }
    %c0 = arith.constant 0 : index
    %c0_1 = arith.constant 0 : index
    %3 = vector.load %arg3[%c0, %c0_1] : memref<8x12xf32, #tpu.memory_space<vmem>>, vector<8x12xf32>
    %c0_2 = arith.constant 0 : index
    %c0_3 = arith.constant 0 : index
    %4 = vector.load %arg2[%c0_2, %c0_3] : memref<12x512xf32, #tpu.memory_space<vmem>>, vector<12x512xf32>
    %cst = arith.constant dense<0.000000e+00> : vector<8x512xf32>
    %5 = tpu.matmul %3, %4, %cst {dimension_numbers = #tpu.dot_dimension_numbers<[1], [0], [0], [1], [0, 0, 1, 1], [], []>} : vector<8x12xf32>, vector<12x512xf32>, vector<8x512xf32> -> vector<8x512xf32>
    %c0_4 = arith.constant 0 : index
    %c0_5 = arith.constant 0 : index
    %c0_6 = arith.constant 0 : index
    %6 = vector.load %arg4[%c0_4, %c0_5, %c0_6] : memref<1x8x1xf32, #tpu.memory_space<vmem>>, vector<1x8x1xf32>
    %7 = vector.shape_cast %6 : vector<1x8x1xf32> to vector<8x1xf32>
    %cst_7 = arith.constant dense<0.000000e+00> : vector<8xf32>
    %8 = vector.multi_reduction <add>, %5, %cst_7 [1] : vector<8x512xf32> to vector<8xf32>
    %9 = vector.shape_cast %8 : vector<8xf32> to vector<8x1xf32>
    %10 = arith.addf %7, %9 : vector<8x1xf32>
    %c0_8 = arith.constant 0 : index
    %c0_9 = arith.constant 0 : index
    %c0_10 = arith.constant 0 : index
    %11 = vector.load %arg4[%c0_8, %c0_9, %c0_10] : memref<1x8x1xf32, #tpu.memory_space<vmem>>, vector<1x8x1xf32>
    %12 = vector.shape_cast %11 : vector<1x8x1xf32> to vector<8x1xf32>
    %13 = vector.shape_cast %10 : vector<8x1xf32> to vector<1x8x1xf32>
    tpu.vector_store %arg4[%c0_8, %c0_9, %c0_10], %13 {strides = array<i32>} : memref<1x8x1xf32, #tpu.memory_space<vmem>>, vector<1x8x1xf32>,
    %c0_11 = arith.constant 0 : index
    %c0_12 = arith.constant 0 : index
    %c0_13 = arith.constant 0 : index
    %14 = vector.load %arg5[%c0_11, %c0_12, %c0_13] : memref<1x8x1xf32, #tpu.memory_space<vmem>>, vector<1x8x1xf32>
    %15 = vector.shape_cast %14 : vector<1x8x1xf32> to vector<8x1xf32>
    %16 = arith.mulf %5, %5 : vector<8x512xf32>
    %cst_14 = arith.constant dense<0.000000e+00> : vector<8xf32>
    %17 = vector.multi_reduction <add>, %16, %cst_14 [1] : vector<8x512xf32> to vector<8xf32>
    %18 = vector.shape_cast %17 : vector<8xf32> to vector<8x1xf32>
    %19 = arith.addf %15, %18 : vector<8x1xf32>
    %c0_15 = arith.constant 0 : index
    %c0_16 = arith.constant 0 : index
    %c0_17 = arith.constant 0 : index
    %20 = vector.load %arg5[%c0_15, %c0_16, %c0_17] : memref<1x8x1xf32, #tpu.memory_space<vmem>>, vector<1x8x1xf32>
    %21 = vector.shape_cast %20 : vector<1x8x1xf32> to vector<8x1xf32>
    %22 = vector.shape_cast %19 : vector<8x1xf32> to vector<1x8x1xf32>
    tpu.vector_store %arg5[%c0_15, %c0_16, %c0_17], %22 {strides = array<i32>} : memref<1x8x1xf32, #tpu.memory_space<vmem>>, vector<1x8x1xf32>,
    return
  }
  func.func @transform_0(%arg0: i32, %arg1: i32) -> (i32, i32) {
    %c1_i32 = arith.constant 1 : i32
    %0 = arith.muli %arg0, %c1_i32 : i32
    %1 = arith.addi %0, %arg1 : i32
    %c0_i32 = arith.constant 0 : i32
    %c0_i32_0 = arith.constant 0 : i32
    return %c0_i32, %1 : i32, i32
  }
  func.func @transform_1(%arg0: i32, %arg1: i32) -> (i32, i32) {
    %c0_i32 = arith.constant 0 : i32
    %c0_i32_0 = arith.constant 0 : i32
    %c0_i32_1 = arith.constant 0 : i32
    return %c0_i32, %c0_i32_0 : i32, i32
  }
  func.func @transform_2(%arg0: i32, %arg1: i32) -> (i32, i32, i32) {
    %c0_i32 = arith.constant 0 : i32
    %c0_i32_0 = arith.constant 0 : i32
    %c0_i32_1 = arith.constant 0 : i32
    return %arg0, %c0_i32, %c0_i32_0 : i32, i32, i32
  }
  func.func @transform_3(%arg0: i32, %arg1: i32) -> (i32, i32, i32) {
    %c0_i32 = arith.constant 0 : i32
    %c0_i32_0 = arith.constant 0 : i32
    %c0_i32_1 = arith.constant 0 : i32
    return %arg0, %c0_i32, %c0_i32_0 : i32, i32, i32
  }
}

</mosaic_0001>

<bundles_post_ra>
// kernel: tpu_custom_call.1
= control target key start
LH: loop header
LB: loop body
LE: loop exit
PB: predicated region body
PF: predicated region fallthrough
CT: control target
= control target key end

     0   :  { %9 = vsyncpa [#allocation3], 0  ;;  %s359_s0 = inlined_call_operand.hbm [shape: f32[12,512], index: 0, kind: input, shape index: {}]   ;;  %s360_s1 = inlined_call_operand.hbm [shape: f32[8,12], index: 1, kind: input, shape index: {}]   ;;  %s361_s2 = inlined_call_operand.vmem [shape: f32[1,8,1], index: 2, kind: output, shape index: {0}]   ;;  %s362_s3 = inlined_call_operand.vmem [shape: f32[1,8,1], index: 3, kind: output, shape index: {1}]  }
   0x1   :  { %10 = vsyncpa [#allocation5], 0  ;;  %s306_s12 = smov [#allocation2]  }
   0x2   :  { %s20_s13 = sshll.u32 %s306_s12, 4  ;;  %s21_s13 = int_to_ptr.vmem [resolvable:$true] %s20_s13 }
   0x3   :  { %s270_s14 = scalar_lea.vmem %s21_s13, 1024  ;;  %p275_p1 = scmp.lt.s32.totalorder %s21_s13, %s21_s13 }
   0x4   :  { %p271_p0 = scmp.ne.s32.totalorder %s21_s13, %s270_s14  ;;  %p276_p2 = scmp.lt.s32.totalorder %s270_s14, %s270_s14 }
   0x6   :  { %p277_p3 = por %p276_p2, %p275_p1 }
   0x8   :  { %p278_p4 = pnand %p277_p3, %p271_p0 }
   0xa   :  { %281 = shalt.err (!%p278_p4)
}
   0xb   :  { %s307_s15 = smov 512   ;;  %s308_s16 = smov 32  }
   0xc   :  { %26 = dma.hbm_to_vmem [thread:$0]  %s359_s0, 1024, %s21_s13, [#allocation3], %s307_s15, %s307_s15, %s308_s16  }
   0xd   :  { %s309_s19 = smov [#allocation4]  }
   0xe   :  { %s33_s20 = sshll.u32 %s309_s19, 4  ;;  %s34_s20 = int_to_ptr.vmem [resolvable:$true] %s33_s20 }
   0xf   :  { %s290_s21 = scalar_lea.vmem %s34_s20, 128  ;;  %p295_p6 = scmp.lt.s32.totalorder %s34_s20, %s34_s20 }
  0x10   :  { %p291_p5 = scmp.ne.s32.totalorder %s34_s20, %s290_s21  ;;  %p296_p7 = scmp.lt.s32.totalorder %s290_s21, %s290_s21 }
  0x12   :  { %p297_p8 = por %p296_p7, %p295_p6 }
  0x14   :  { %p298_p9 = pnand %p297_p8, %p291_p5 }
  0x16   :  { %301 = shalt.err (!%p298_p9)
}
  0x17   :  { %36 = dma.hbm_to_vmem [thread:$0]  %s360_s1, 128, %s34_s20, [#allocation5]  }
  0x18   :  { %302 = dma.done.wait [#allocation3], 1024  }
  0x19   :  { %303 = vsyncadd [#allocation3], 4294966272 }
  0x1a   :  { %304 = dma.done.wait [#allocation5], 128  }
  0x1b   :  { %305 = vsyncadd [#allocation5], 4294967168  ;;  %vm49_vm0 = vcmask 7168   ;;  %v310_v0 = vmov 0.0   ;;  %vm65_vm1 = vcmask 1043456   ;;  %v54_v3 = vld [vmem:[#allocation2 + $0x8] sm:$0xff] }
  0x1c   :  { %50 = vst.msk [vmem:[%s361_s2] sm:$0xff] %vm49_vm0, %v310_v0  ;;  %51 = vst.msk [vmem:[%s362_s3] sm:$0xff] %vm49_vm0, %v310_v0  ;;  %142 = vmatprep.mubr.f32.mxu0 %v310_v0  ;;  %213 = vmatprep.mubr.f32.mxu1 %v310_v0  ;;  %v58_v1 = vld [vmem:[#allocation2 + $0x28] sm:$0xf]  ;;  %v57_v2 = vld [vmem:[#allocation2 + $0x20] sm:$0xf] }
  0x1d   :  { %251 = vmatprep.subr.msk.mxu0 %vm65_vm1, %v58_v1  ;;  %v60_v4 = vld [vmem:[#allocation2 + $0x38] sm:$0xf]  ;;  %v53_v5 = vld [vmem:[#allocation2] sm:$0xff]  ;;  %v59_v6 = vld [vmem:[#allocation2 + $0x30] sm:$0xf]  ;;  %vm61_vm2 = vcmask 97280  }
  0x1e   :  { %252 = vmatpush1.msk.msra.mxu0 %vm65_vm1, %v57_v2  ;;  %254 = vmatprep.subr.msk.mxu1 %vm65_vm1, %v60_v4  ;;  %v52_v7 = vld [vmem:[#allocation4] sm:$0xff]  ;;  %v56_v8 = vld [vmem:[#allocation2 + $0x18] sm:$0xff]  ;;  %v55_v9 = vld [vmem:[#allocation2 + $0x10] sm:$0xff] }
  0x1f   :  { %108 = vmatprep.subr.mxu0 %v54_v3  ;;  %255 = vmatpush1.msk.msra.mxu1 %vm65_vm1, %v59_v6 }
  0x20   :  { %109 = vmatpush1.msra.mxu0 %v53_v5  ;;  %179 = vmatprep.subr.mxu1 %v56_v8 }
  0x21   :  { %253 = vmatmul.mubr.msk.f32.vlgmr.msra.gmra.mxu0 %vm61_vm2, %v52_v7  ;;  %180 = vmatpush1.msra.mxu1 %v55_v9 }
  0x22   :  { %256 = vmatmul.mubr.msk.f32.vlgmr.msra.gmra.mxu1 %vm61_vm2, %v52_v7 }
  0x23   :  { %v220_v24 = vld [vmem:[%s361_s2] sm:$0xff] }
  0x24   :  { %v229_v27 = vld [vmem:[%s362_s3] sm:$0xff] }
  0xe1   :  { %v144_v10 = vpop.f32.mrf.mxu0 }
  0xe2   :  { %v215_v12 = vpop.f32.mrf.mxu1  ;;  %v230_v13 = vmul.f32 %v144_v10, %v144_v10 }
  0xe3   :  { %v146_v11 = vpop.f32.mrf.mxu0  ;;  %v232_v16 = vmul.f32 %v215_v12, %v215_v12 }
  0xe4   :  { %v221_v14 = vadd.f32 %v146_v11, %v144_v10  ;;  %v231_v15 = vmul.f32 %v146_v11, %v146_v11  ;;  %v217_v19 = vpop.f32.mrf.mxu1 }
  0xe5   :  { %v233_v22 = vmul.f32 %v217_v19, %v217_v19 }
  0xe6   :  { %v234_v17 = vadd.f32 %v231_v15, %v230_v13  ;;  %v222_v18 = vadd.f32 %v221_v14, %v215_v12 }
  0xe8   :  { %v223_v20 = vadd.f32 %v222_v18, %v217_v19  ;;  %v235_v21 = vadd.f32 %v234_v17, %v232_v16 }
  0xea   :  { %224 = vadd.xlane.f32.xlu0 %v223_v20  ;;  %v236_v23 = vadd.f32 %v235_v21, %v233_v22 }
  0xee   :  { %237 = vadd.xlane.f32.xlu0 %v236_v23 }
 0x173   :  { %v225_v25 = vpop.xlane.xlu0 %224 }
 0x174   :  { %v226_v26 = vadd.f32 %v225_v25, %v220_v24 }
 0x176   :  { %228 = vst.msk [vmem:[%s361_s2] sm:$0xff] %vm49_vm0, %v226_v26 }
 0x177   :  { %v238_v28 = vpop.xlane.xlu0 %237 }
 0x178   :  { %v239_v29 = vadd.f32 %v238_v28, %v229_v27 }
 0x17a   :  { %240 = vst.msk [vmem:[%s362_s3] sm:$0xff] %vm49_vm0, %v239_v29 }
 0x17b   :  { %249 = vsyncpa [#allocation3], 1 }
 0x17c   :  { %250 = vsyncpa [#allocation5], 1 }

</bundles_post_ra>
